<compile_context>
chip_gen: v7x
topology: tpu7x:2x2x1
jax: 0.10.0
libtpu: 0.0.40
codegen_flags: <defaults>
</compile_context>

<pallas_src>
import functools

import jax
import jax.numpy as jnp
from jax import lax
from jax.experimental import pallas as pl
from jax.experimental.pallas import tpu as pltpu


def _round_up(x, m):
    return ((x + m - 1) // m) * m


def _spatial_gather_kernel(probs_ref, feats_ref, out_ref,
                           acc_ref, m_ref, l_ref, *, scale, hw, hw_tile):
    # probs_ref: (1, K, hw_tile)   feats_ref: (1, hw_tile, c_tile)
    # out_ref:   (1, K, c_tile)    acc_ref: (K, c_tile) f32
    # m_ref/l_ref: (K, 1) f32 running max / running sum
    t = pl.program_id(2)

    @pl.when(t == 0)
    def _init():
        m_ref[...] = jnp.full_like(m_ref, -jnp.inf)
        l_ref[...] = jnp.zeros_like(l_ref)
        acc_ref[...] = jnp.zeros_like(acc_ref)

    p = probs_ref[0].astype(jnp.float32)                    # (K, hw_tile)
    if scale != 1.0:                                        # static branch
        p = p * jnp.float32(scale)

    if hw % hw_tile != 0:                                   # static branch: padding exists
        start = t * hw_tile
        col = lax.broadcasted_iota(jnp.int32, p.shape, 1) + start
        p = jnp.where(col < hw, p, -jnp.inf)

    # online softmax update (f32)
    m_prev = m_ref[...]                                     # (K, 1)
    m_new = jnp.maximum(m_prev, jnp.max(p, axis=-1, keepdims=True))
    alpha = jnp.exp(m_prev - m_new)                         # (K, 1)
    e = jnp.exp(p - m_new)                                  # (K, hw_tile)
    l_ref[...] = alpha * l_ref[...] + jnp.sum(e, axis=-1, keepdims=True)

    # MXU: (K, hw_tile) x (hw_tile, c_tile) -> (K, c_tile); feats kept in
    # native dtype, weights cast down, f32 accumulation.
    f = feats_ref[0]
    contrib = jnp.dot(e.astype(f.dtype), f, preferred_element_type=jnp.float32)
    acc_ref[...] = alpha * acc_ref[...] + contrib
    m_ref[...] = m_new

    @pl.when(t == pl.num_programs(2) - 1)
    def _finalize():
        inv_l = pl.reciprocal(l_ref[...], approx=True)      # once per (b, c) block
        out_ref[0] = (acc_ref[...] * inv_l).astype(out_ref.dtype)


def spatial_gather(feats, probs, scale=1.0, *, hw_tile=2048, c_tile=None,
                   vmem_limit_bytes=64 * 1024 * 1024):
    """feats: (B, C, H, W), probs: (B, K, H, W) -> (B, C, K, 1)."""
    B, C, H, W = feats.shape
    Bp, K, Hp, Wp = probs.shape
    assert (B, H, W) == (Bp, Hp, Wp)
    HW = H * W

    # spatial tile: lane-aligned (multiple of 128), capped at padded HW
    hw_tile = max(128, (int(hw_tile) // 128) * 128)
    hw_tile = min(hw_tile, _round_up(HW, 128))
    hw_pad = _round_up(HW, hw_tile)
    num_hw = hw_pad // hw_tile

    # channel tile (output lane dim): full C unless explicitly tiled
    if c_tile is None or c_tile >= C:
        c_tile = C
    else:
        assert C % c_tile == 0 and c_tile % 128 == 0, (
            "c_tile must divide C and be a multiple of 128")
    num_c = C // c_tile

    probs_r = probs.reshape(B, K, HW)
    # contraction (spatial) dim leading on the feats side -> (B, HW, C)
    feats_r = jnp.transpose(feats.reshape(B, C, HW), (0, 2, 1))

    if hw_pad != HW:
        probs_r = jnp.pad(probs_r, ((0, 0), (0, 0), (0, hw_pad - HW)))
        feats_r = jnp.pad(feats_r, ((0, 0), (0, hw_pad - HW), (0, 0)))

    kernel = functools.partial(
        _spatial_gather_kernel, scale=float(scale), hw=HW, hw_tile=hw_tile)

    ctx = pl.pallas_call(
        kernel,
        out_shape=jax.ShapeDtypeStruct((B, K, C), feats.dtype),
        grid_spec=pltpu.PrefetchScalarGridSpec(
            num_scalar_prefetch=0,
            grid=(B, num_c, num_hw),                        # reduction axis last
            in_specs=[
                pl.BlockSpec((1, K, hw_tile), lambda b, c, t: (b, 0, t)),
                pl.BlockSpec((1, hw_tile, c_tile), lambda b, c, t: (b, t, c)),
            ],
            out_specs=pl.BlockSpec((1, K, c_tile), lambda b, c, t: (b, 0, c)),
            scratch_shapes=[
                pltpu.VMEM((K, c_tile), jnp.float32),       # accumulator
                pltpu.VMEM((K, 1), jnp.float32),            # running max
                pltpu.VMEM((K, 1), jnp.float32),            # running sum
            ],
        ),
        compiler_params=pltpu.CompilerParams(
            dimension_semantics=("parallel", "parallel", "arbitrary"),
            vmem_limit_bytes=vmem_limit_bytes),
    )(probs_r, feats_r)                                     # (B, K, C)

    # permute(0, 2, 1).unsqueeze(3) -> (B, C, K, 1)
    return jnp.transpose(ctx, (0, 2, 1))[..., None]


def _reference(feats, probs, scale=1.0):
    B, C, H, W = feats.shape
    _, K, _, _ = probs.shape
    p = probs.reshape(B, K, H * W).astype(jnp.float32)
    f = feats.reshape(B, C, H * W).transpose(0, 2, 1).astype(jnp.float32)
    p = jax.nn.softmax(scale * p, axis=2)
    ctx = jnp.einsum("bkh,bhc->bkc", p, f)
    return jnp.transpose(ctx, (0, 2, 1))[..., None]


if __name__ == "__main__":
    key = jax.random.PRNGKey(0)

    cases = [
        # basic small shape, single tile
        dict(B=2, C=32, K=4, H=16, W=16, scale=1.0, dtype=jnp.float32,
             kwargs={}, tol=1e-2),
        # multi HW tile + C tiling (exercises online softmax + c grid axis)
        dict(B=1, C=256, K=8, H=32, W=32, scale=2.0, dtype=jnp.float32,
             kwargs=dict(hw_tile=256, c_tile=128), tol=1e-2),
        # HW not a multiple of 128 -> padding + in-kernel masking path
        dict(B=2, C=32, K=5, H=9, W=9, scale=1.0, dtype=jnp.float32,
             kwargs={}, tol=1e-2),
        # bf16 feats/probs: bf16 MXU operands, f32 accumulation
        dict(B=1, C=128, K=8, H=32, W=32, scale=1.0, dtype=jnp.bfloat16,
             kwargs=dict(hw_tile=256), tol=5e-2),
    ]

    for i, cfg in enumerate(cases):
        key, kf, kp = jax.random.split(key, 3)
        feats = jax.random.normal(
            kf, (cfg["B"], cfg["C"], cfg["H"], cfg["W"]),
            dtype=jnp.float32).astype(cfg["dtype"])
        probs = jax.random.normal(
            kp, (cfg["B"], cfg["K"], cfg["H"], cfg["W"]),
            dtype=jnp.float32).astype(cfg["dtype"])

        out = spatial_gather(feats, probs, scale=cfg["scale"], **cfg["kwargs"])
        out = jax.block_until_ready(out)

        ref = _reference(feats, probs, scale=cfg["scale"])
        assert out.shape == (cfg["B"], cfg["C"], cfg["K"], 1), (i, out.shape)
        out_f32 = out.astype(jnp.float32)
        err = float(jnp.max(jnp.abs(out_f32 - ref)))
        assert jnp.allclose(out_f32, ref, atol=cfg["tol"], rtol=cfg["tol"]), (i, err)

    print("KERNEL_OK")
</pallas_src>

<mosaic_0001>
module attributes {stable_mosaic.version = 11 : i64} {
  func.func @_spatial_gather_kernel(%arg0: i32, %arg1: i32, %arg2: i32, %arg3: memref<1x4x256xf32, #tpu.memory_space<vmem>>, %arg4: memref<1x256x32xf32, #tpu.memory_space<vmem>>, %arg5: memref<1x4x32xf32, #tpu.memory_space<vmem>>, %arg6: memref<4x32xf32, #tpu.memory_space<vmem>>, %arg7: memref<4x1xf32, #tpu.memory_space<vmem>>, %arg8: memref<4x1xf32, #tpu.memory_space<vmem>>) attributes {dimension_semantics = [#tpu.dimension_semantics<parallel>, #tpu.dimension_semantics<parallel>, #tpu.dimension_semantics<arbitrary>], iteration_bounds = array<i64: 2, 1, 1>, scalar_prefetch = 0 : i64, scratch_operands = 3 : i64, tpu.core_type = #tpu.core_type<tc>, window_params = [{transform_indices = @transform_0, window_bounds = array<i64: 1, 4, 256>}, {transform_indices = @transform_1, window_bounds = array<i64: 1, 256, 32>}, {transform_indices = @transform_2, window_bounds = array<i64: 1, 4, 32>}]} {
    %c0_i32 = arith.constant 0 : i32
    %0 = arith.cmpi eq, %arg2, %c0_i32 : i32
    %1 = arith.extui %0 : i1 to i32
    %c0_i32_0 = arith.constant 0 : i32
    %2 = arith.cmpi ne, %1, %c0_i32_0 : i32
    scf.if %2 {
      %cst_22 = arith.constant 0xFF800000 : f32
      %32 = vector.broadcast %cst_22 : f32 to vector<4x1xf32>
      %c0_23 = arith.constant 0 : index
      %c0_24 = arith.constant 0 : index
      %33 = vector.load %arg7[%c0_23, %c0_24] : memref<4x1xf32, #tpu.memory_space<vmem>>, vector<4x1xf32>
      tpu.vector_store %arg7[%c0_23, %c0_24], %32 {strides = array<i32>} : memref<4x1xf32, #tpu.memory_space<vmem>>, vector<4x1xf32>,
      %cst_25 = arith.constant 0.000000e+00 : f32
      %34 = vector.broadcast %cst_25 : f32 to vector<4x1xf32>
      %c0_26 = arith.constant 0 : index
      %c0_27 = arith.constant 0 : index
      %35 = vector.load %arg8[%c0_26, %c0_27] : memref<4x1xf32, #tpu.memory_space<vmem>>, vector<4x1xf32>
      tpu.vector_store %arg8[%c0_26, %c0_27], %34 {strides = array<i32>} : memref<4x1xf32, #tpu.memory_space<vmem>>, vector<4x1xf32>,
      %cst_28 = arith.constant 0.000000e+00 : f32
      %36 = vector.broadcast %cst_28 : f32 to vector<4x32xf32>
      %c0_29 = arith.constant 0 : index
      %c0_30 = arith.constant 0 : index
      %37 = vector.load %arg6[%c0_29, %c0_30] : memref<4x32xf32, #tpu.memory_space<vmem>>, vector<4x32xf32>
      tpu.vector_store %arg6[%c0_29, %c0_30], %36 {strides = array<i32>} : memref<4x32xf32, #tpu.memory_space<vmem>>, vector<4x32xf32>,
    } else {
    }
    %c0 = arith.constant 0 : index
    %c0_1 = arith.constant 0 : index
    %c0_2 = arith.constant 0 : index
    %3 = vector.load %arg3[%c0, %c0_1, %c0_2] : memref<1x4x256xf32, #tpu.memory_space<vmem>>, vector<1x4x256xf32>
    %4 = vector.shape_cast %3 : vector<1x4x256xf32> to vector<4x256xf32>
    %c0_3 = arith.constant 0 : index
    %c0_4 = arith.constant 0 : index
    %5 = vector.load %arg7[%c0_3, %c0_4] : memref<4x1xf32, #tpu.memory_space<vmem>>, vector<4x1xf32>
    %cst = arith.constant dense<0xFF800000> : vector<4xf32>
    %6 = vector.multi_reduction <maximumf>, %4, %cst [1] : vector<4x256xf32> to vector<4xf32>
    %7 = vector.shape_cast %6 : vector<4xf32> to vector<4x1xf32>
    %8 = arith.maximumf %5, %7 : vector<4x1xf32>
    %9 = arith.subf %5, %8 : vector<4x1xf32>
    %10 = math.exp %9 : vector<4x1xf32>
    %11 = vector.broadcast %8 : vector<4x1xf32> to vector<4x256xf32>
    %12 = arith.subf %4, %11 : vector<4x256xf32>
    %13 = math.exp %12 : vector<4x256xf32>
    %c0_5 = arith.constant 0 : index
    %c0_6 = arith.constant 0 : index
    %14 = vector.load %arg8[%c0_5, %c0_6] : memref<4x1xf32, #tpu.memory_space<vmem>>, vector<4x1xf32>
    %15 = arith.mulf %10, %14 : vector<4x1xf32>
    %cst_7 = arith.constant dense<0.000000e+00> : vector<4xf32>
    %16 = vector.multi_reduction <add>, %13, %cst_7 [1] : vector<4x256xf32> to vector<4xf32>
    %17 = vector.shape_cast %16 : vector<4xf32> to vector<4x1xf32>
    %18 = arith.addf %15, %17 : vector<4x1xf32>
    %c0_8 = arith.constant 0 : index
    %c0_9 = arith.constant 0 : index
    %19 = vector.load %arg8[%c0_8, %c0_9] : memref<4x1xf32, #tpu.memory_space<vmem>>, vector<4x1xf32>
    tpu.vector_store %arg8[%c0_8, %c0_9], %18 {strides = array<i32>} : memref<4x1xf32, #tpu.memory_space<vmem>>, vector<4x1xf32>,
    %c0_10 = arith.constant 0 : index
    %c0_11 = arith.constant 0 : index
    %c0_12 = arith.constant 0 : index
    %20 = vector.load %arg4[%c0_10, %c0_11, %c0_12] : memref<1x256x32xf32, #tpu.memory_space<vmem>>, vector<1x256x32xf32>
    %21 = vector.shape_cast %20 : vector<1x256x32xf32> to vector<256x32xf32>
    %cst_13 = arith.constant dense<0.000000e+00> : vector<4x32xf32>
    %22 = tpu.matmul %13, %21, %cst_13 {dimension_numbers = #tpu.dot_dimension_numbers<[1], [0], [0], [1], [0, 0, 1, 1], [], []>} : vector<4x256xf32>, vector<256x32xf32>, vector<4x32xf32> -> vector<4x32xf32>
    %c0_14 = arith.constant 0 : index
    %c0_15 = arith.constant 0 : index
    %23 = vector.load %arg6[%c0_14, %c0_15] : memref<4x32xf32, #tpu.memory_space<vmem>>, vector<4x32xf32>
    %24 = vector.broadcast %10 : vector<4x1xf32> to vector<4x32xf32>
    %25 = arith.mulf %24, %23 : vector<4x32xf32>
    %26 = arith.addf %25, %22 : vector<4x32xf32>
    %c0_16 = arith.constant 0 : index
    %c0_17 = arith.constant 0 : index
    %27 = vector.load %arg6[%c0_16, %c0_17] : memref<4x32xf32, #tpu.memory_space<vmem>>, vector<4x32xf32>
    tpu.vector_store %arg6[%c0_16, %c0_17], %26 {strides = array<i32>} : memref<4x32xf32, #tpu.memory_space<vmem>>, vector<4x32xf32>,
    %c0_18 = arith.constant 0 : index
    %c0_19 = arith.constant 0 : index
    %28 = vector.load %arg7[%c0_18, %c0_19] : memref<4x1xf32, #tpu.memory_space<vmem>>, vector<4x1xf32>
    tpu.vector_store %arg7[%c0_18, %c0_19], %8 {strides = array<i32>} : memref<4x1xf32, #tpu.memory_space<vmem>>, vector<4x1xf32>,
    %c0_i32_20 = arith.constant 0 : i32
    %29 = arith.cmpi eq, %arg2, %c0_i32_20 : i32
    %30 = arith.extui %29 : i1 to i32
    %c0_i32_21 = arith.constant 0 : i32
    %31 = arith.cmpi ne, %30, %c0_i32_21 : i32
    scf.if %31 {
      %c0_22 = arith.constant 0 : index
      %c0_23 = arith.constant 0 : index
      %32 = vector.load %arg8[%c0_22, %c0_23] : memref<4x1xf32, #tpu.memory_space<vmem>>, vector<4x1xf32>
      %33 = tpu.reciprocal %32 {approx = true} : vector<4x1xf32> -> vector<4x1xf32>
      %c0_24 = arith.constant 0 : index
      %c0_25 = arith.constant 0 : index
      %34 = vector.load %arg6[%c0_24, %c0_25] : memref<4x32xf32, #tpu.memory_space<vmem>>, vector<4x32xf32>
      %35 = vector.broadcast %33 : vector<4x1xf32> to vector<4x32xf32>
      %36 = arith.mulf %34, %35 : vector<4x32xf32>
      %c0_26 = arith.constant 0 : index
      %c0_27 = arith.constant 0 : index
      %c0_28 = arith.constant 0 : index
      %37 = vector.load %arg5[%c0_26, %c0_27, %c0_28] : memref<1x4x32xf32, #tpu.memory_space<vmem>>, vector<1x4x32xf32>
      %38 = vector.shape_cast %37 : vector<1x4x32xf32> to vector<4x32xf32>
      %39 = vector.shape_cast %36 : vector<4x32xf32> to vector<1x4x32xf32>
      tpu.vector_store %arg5[%c0_26, %c0_27, %c0_28], %39 {strides = array<i32>} : memref<1x4x32xf32, #tpu.memory_space<vmem>>, vector<1x4x32xf32>,
    } else {
    }
    return
  }
  func.func @transform_0(%arg0: i32, %arg1: i32, %arg2: i32) -> (i32, i32, i32) {
    %c0_i32 = arith.constant 0 : i32
    %c0_i32_0 = arith.constant 0 : i32
    return %arg0, %c0_i32, %arg2 : i32, i32, i32
  }
  func.func @transform_1(%arg0: i32, %arg1: i32, %arg2: i32) -> (i32, i32, i32) {
    %c0_i32 = arith.constant 0 : i32
    return %arg0, %arg2, %arg1 : i32, i32, i32
  }
  func.func @transform_2(%arg0: i32, %arg1: i32, %arg2: i32) -> (i32, i32, i32) {
    %c0_i32 = arith.constant 0 : i32
    %c0_i32_0 = arith.constant 0 : i32
    return %arg0, %c0_i32, %arg1 : i32, i32, i32
  }
}

</mosaic_0001>

<bundles_post_ra>
// kernel: tpu_custom_call.1
= control target key start
LH: loop header
LB: loop body
LE: loop exit
PB: predicated region body
PF: predicated region fallthrough
CT: control target
= control target key end

     0   :  { %7 = vsyncpa [#allocation6], 0  ;;  %s1161_s0 = inlined_call_operand.hbm [shape: f32[2,4,256], index: 0, kind: input, shape index: {}]   ;;  %s1162_s1 = inlined_call_operand.hbm [shape: f32[2,256,32], index: 1, kind: input, shape index: {}]   ;;  %s1163_s2 = inlined_call_operand.hbm [shape: f32[2,4,32], index: 2, kind: output, shape index: {}]  }
   0x1   :  { %9 = vsyncpa [#allocation6 + $0x1], 0 }
   0x2   :  { %10 = vsyncpa [#allocation9], 0 }
   0x3   :  { %12 = vsyncpa [#allocation9 + $0x1], 0 }
   0x4   :  { %13 = vsyncpa [#allocation7], 0 }
   0x5   :  { %15 = vsyncpa [#allocation7 + $0x1], 0  ;;  %s880_s9 = smov 0   ;;  %s882_s10 = smov 0  }
   0x6   :  { %s884_s11 = smov 0   ;;  %s886_s12 = smov 0  }
   0x7   :  { %s888_s13 = smov 0   ;;  %s890_s14 = smov 0  }
   0x8 LB: > { %s539_s15 = sadd.s32 4294967295, %s854_s14   ;;  %s540_s16 = sadd.s32 4294967294, %s854_s14   ;;  %s854_s14 = sphi %s890_s14, %s21_s14   ;;  %s850_s13 = sphi %s888_s13, %s1182_s13   ;;  %s846_s12 = sphi %s886_s12, %s1181_s12   ;;  %s842_s11 = sphi %s884_s11, %s1180_s11   ;;  %s838_s10 = sphi %s882_s10, %s1179_s10   ;;  %s834_s9 = sphi %s880_s9, %s1178_s9  }
   0x9   : > { %s40_s17 = sadd.s32 1, %s850_s13  ;;  %s49_s18 = sadd.s32 1, %s842_s11 }
   0xa   : > { %p42_p0 = scmp.ge.s32.totalorder %s40_s17, 2  ;;  %p56_p1 = scmp.ne.s32.totalorder %s842_s11, %s838_s10 }
   0xb   : > { %p57_p2 = scmp.eq.s32.totalorder %s854_s14, 0  ;;  %p62_p3 = scmp.ne.s32.totalorder %s838_s10, %s834_s9 }
   0xc   : > { %s1184_s17 = smov (%p42_p0, %s40_s17), 0  ;;  %p63_p5 = scmp.eq.s32.totalorder %s539_s15, 0 }
   0xd   : > { %p921_p4 = por %p57_p2, %p56_p1  ;;  %s44_s20 = ssub.s32 %s850_s13, %s1184_s17 }
   0xe   : > { %p118_p6 = scmp.eq.s32.totalorder %s539_s15, 1  ;;  %p47_p7 = scmp.eq.s32.totalorder %s44_s20, 0 }
   0xf   : > { %p927_p8 = por %p63_p5, %p62_p3  ;;  %p124_p10 = scmp.eq.s32.totalorder %s540_s16, 1 }
  0x10   : > { %p931_p9 = por %p118_p6, %p56_p1  ;;  %p643_p13 = scmp.lt.s32.totalorder %s854_s14, 2 }
  0x11   : > { %s1167_s21 = scalar_select %p927_p8, 1, 0 }
  0x12   : > { %s1168_s22 = scalar_select %p931_p9, 1, 0 }
  0x13   : > { %s936_s23 = scalar_select %p47_p7, %s842_s11, %s49_s18  }
  0x14   : > { %p938_p11 = por %p124_p10, %p62_p3  ;;  %s945_s25 = sand.u32 1, %s842_s11  }
  0x15   : > { %s543_s26 = sshll.u32 %s945_s25, 3  ;;  %s557_s27 = sshll.u32 %s850_s13, 7 }
  0x16   : > { %s1169_s24 = scalar_select %p938_p11, 1, 0 }
  0x17   : > { %s952_s30 = scalar_lea.hbm %s1161_s0, %s557_s27  ;;  %s148_s3 = scalar_lea.vmem [#allocation5], %s543_s26 }
  0x18   : > { %s158_s4 = sshll.u32 %s148_s3, 4  ;;  %p958_p0 = pnand %p643_p13, %p921_p4  ;;  %s954_s4 = int_to_ptr.vmem [resolvable:$true] %s158_s4 }
  0x19   : > { %s145_s6 = scalar_lea.sflag [#allocation6], %s945_s25  ;;  %s708_s7 = scalar_lea.hbm %s952_s30, 128 }
  0x1a   : > { %p709_p3 = scmp.ne.s32.totalorder %s952_s30, %s708_s7  ;;  %p710_p5 = pneg %p958_p0 }
  0x1b   : > { %s713_s16 = scalar_lea.hbm %s1161_s0, 256  ;;  %p714_p4 = scmp.lt.u32.totalorder %s952_s30, %s1161_s0 }
  0x1c   : > { %p711_p6 = pnand %p710_p5, %p709_p3  ;;  %p715_p10 = scmp.lt.u32.totalorder %s713_s16, %s708_s7 }
  0x1d   : > { %p717_p12 = scmp.lt.u32.totalorder %s708_s7, %s952_s30 }
  0x1e   : > { %p712_p7 = pneg %p711_p6  ;;  %p716_p13 = por %p715_p10, %p714_p4 }
  0x20   : > { %p718_p1 = por %p717_p12, %p716_p13 }
  0x22   : > { %p719_p2 = pnand %p718_p1, %p712_p7 }
  0x24   : > { %722 = shalt.err (!%p719_p2)
}
  0x25   : > { %s723_s20 = scalar_lea.vmem %s954_s4, 128  ;;  %s856_s26 = smov [#allocation5]  }
  0x26   : > { %p724_p3 = scmp.ne.s32.totalorder %s954_s4, %s723_s20  ;;  %s728_s27 = sshll.u32 %s856_s26, 4  ;;  %s729_s27 = int_to_ptr.vmem [resolvable:$false] %s728_s27 }
  0x27   : > { %s730_s28 = scalar_lea.vmem %s729_s27, 256  ;;  %p731_p9 = scmp.lt.s32.totalorder %s954_s4, %s729_s27 }
  0x28   : > { %p726_p6 = pnand %p724_p3, %p710_p5  ;;  %p732_p4 = scmp.lt.s32.totalorder %s730_s28, %s723_s20 }
  0x2a   : > { %p727_p11 = pneg %p726_p6  ;;  %p733_p10 = por %p732_p4, %p731_p9 }
  0x2c   : > { %p734_p12 = pnand %p733_p10, %p727_p11 }
  0x2e   : > { %737 = shalt.err (!%p734_p12)
}
  0x2f   : > { %635 = dma.hbm_to_vmem [thread:$0]  (!%p958_p0), %s952_s30, 128, %s954_s4, %s145_s6  }
  0x30   : > { %p1171_p1 = scmp.lt.s32.totalorder %s854_s14, 3  ;;  %p1172_p2 = scmp.ge.s32.totalorder %s854_s14, 1 }
  0x31   : > { %s546_s3 = sshll.u32 %s945_s25, 8  ;;  %s558_s7 = sshll.u32 %s850_s13, 12 }
  0x32   : > { %p994_p7 = pnand %p1172_p2, %p1171_p1  ;;  %s1003_s16 = scalar_lea.hbm %s1162_s1, %s558_s7 }
  0x33   : > { %s169_s18 = scalar_lea.vmem [#allocation8], %s546_s3  ;;  %s166_s30 = scalar_lea.sflag [#allocation9], %s945_s25 }
  0x34   : > { %s179_s19 = sshll.u32 %s169_s18, 4  ;;  %s738_s4 = scalar_lea.hbm %s1003_s16, 4096  ;;  %s1005_s19 = int_to_ptr.vmem [resolvable:$true] %s179_s19 }
  0x35   : > { %p739_p9 = scmp.ne.s32.totalorder %s1003_s16, %s738_s4  ;;  %s743_s26 = scalar_lea.hbm %s1162_s1, 8192 }
  0x36   : > { %p744_p3 = scmp.lt.u32.totalorder %s1003_s16, %s1162_s1  ;;  %p745_p6 = scmp.lt.u32.totalorder %s743_s26, %s738_s4 }
  0x37   : > { %p741_p11 = pnand %p739_p9, %p710_p5  ;;  %p747_p10 = scmp.lt.u32.totalorder %s738_s4, %s1003_s16 }
  0x38   : > { %p746_p4 = por %p745_p6, %p744_p3 }
  0x39   : > { %p742_p13 = pneg %p741_p11 }
  0x3a   : > { %p748_p12 = por %p747_p10, %p746_p4 }
  0x3c   : > { %p749_p1 = pnand %p748_p12, %p742_p13 }
  0x3e   : > { %752 = shalt.err (!%p749_p1)
}
  0x3f   : > { %s753_s3 = scalar_lea.vmem %s1005_s19, 4096  ;;  %s857_s7 = smov [#allocation8]  }
  0x40   : > { %p754_p2 = scmp.ne.s32.totalorder %s1005_s19, %s753_s3  ;;  %s758_s8 = sshll.u32 %s857_s7, 4  ;;  %s759_s8 = int_to_ptr.vmem [resolvable:$false] %s758_s8 }
  0x41   : > { %s760_s15 = scalar_lea.vmem %s759_s8, 8192  ;;  %p761_p8 = scmp.lt.s32.totalorder %s1005_s19, %s759_s8 }
  0x42   : > { %p756_p9 = pnand %p754_p2, %p710_p5  ;;  %p762_p3 = scmp.lt.s32.totalorder %s760_s15, %s753_s3 }
  0x44   : > { %p757_p11 = pneg %p756_p9  ;;  %p763_p6 = por %p762_p3, %p761_p8 }
  0x46   : > { %p764_p4 = pnand %p763_p6, %p757_p11 }
  0x48   : > { %767 = shalt.err (!%p764_p4)
}
  0x49   : > { %s858_s18 = smov 128   ;;  %s859_s4 = smov 8  }
  0x4a   : > { %638 = dma.hbm_to_vmem [thread:$0]  (!%p958_p0), %s1003_s16, 4096, %s1005_s19, %s166_s30, %s858_s18, %s858_s18, %s859_s4  }
  0x4b   : > { %191 = sbr.rel (%p994_p7) target bundleno = 693 (0x2b5), region = 28  ;;  %s1036_s6 = sand.u32 (!%p994_p7), 1, %s838_s10  }
  0x4c   : > { %s550_s20 = sshll.u32 (!%p994_p7), %s1036_s6, 3  ;;  %s194_s26 = scalar_lea.sflag (!%p994_p7), [#allocation6], %s1036_s6 }
  0x4d   : > { %s197_s27 = scalar_lea.vmem (!%p994_p7), [#allocation5], %s550_s20  ;;  %p1174_p8 = scmp.ne.s32.totalorder (!%p994_p7), %s1167_s21, 0 }
  0x52   : > { %821 = dma.done.wait (%p1174_p8), %s194_s26, 128  }
  0x53   : > { %823 = vsyncadd (%p1174_p8), %s194_s26, 4294967168  ;;  %s551_s25 = sshll.u32 %s1036_s6, 8  ;;  %s203_s5 = scalar_lea.sflag [#allocation9], %s1036_s6 }
  0x54   : > { %s1046_s29 = scalar_lea.vmem [#allocation8], %s551_s25 }
  0x55   : > { %825 = dma.done.wait (%p1174_p8), %s203_s5, 4096  }
  0x56   : > { %827 = vsyncadd (%p1174_p8), %s203_s5, 4294963200  ;;  %vm238_vm0 = vcmask 3072   ;;  %v860_v0 = vmov -inf   ;;  %vm248_vm1 = vcmask 1043456   ;;  %v1053_v1 = vld [vmem:[%s197_s27] sm:$0xff]  ;;  %v861_v6 = vmov 0  }
  0x57   : > { %239 = vst.msk [vmem:[#allocation3] sm:$0xf] %vm238_vm0, %v860_v0  ;;  %v246_v2 = vcombine.high %v1053_v1, %v1053_v1  ;;  %v249_v3 = vsel %vm248_vm1, %v1053_v1, -inf  ;;  %699 = vset.pattern.permute.xlu0 %v861_v6  ;;  %700 = vset.pattern.permute.xlu1 %v861_v6  ;;  %v302_v7 = vld [vmem:[%s1046_s29 + $0x80] sm:$0xff]  ;;  %v303_v8 = vld [vmem:[%s1046_s29 + $0x88] sm:$0xff]  ;;  %v304_v12 = vld [vmem:[%s1046_s29 + $0x90] sm:$0xff]  ;;  %v265_v62 = vlaneseq }
  0x58   : > { %v286_v9 = vld [vmem:[%s1046_s29] sm:$0xff]  ;;  %v594_v10 = vpack.c.bf16 %v303_v8, %v302_v7  ;;  %v287_v11 = vld [vmem:[%s1046_s29 + $0x8] sm:$0xff]  ;;  %v305_v13 = vld [vmem:[%s1046_s29 + $0x98] sm:$0xff]  ;;  %v862_v20 = vmov 0.0   ;;  %v863_v60 = vmov 839922192  }
  0x59   : > { %v250_v4 = vsel %vm248_vm1, %v246_v2, -inf  ;;  %v596_v14 = vpack.c.bf16 %v287_v11, %v286_v9  ;;  %v598_v15 = vpack.c.bf16 %v305_v13, %v304_v12  ;;  %v288_v16 = vld [vmem:[%s1046_s29 + $0x10] sm:$0xff]  ;;  %v289_v17 = vld [vmem:[%s1046_s29 + $0x18] sm:$0xff]  ;;  %v306_v18 = vld [vmem:[%s1046_s29 + $0xa0] sm:$0xff]  ;;  %240 = vst.msk [vmem:[#allocation4] sm:$0xf] %vm238_vm0, %v862_v20  ;;  %v263_v61 = vunpack.c.l.s4 %v863_v60 }
  0x5a   : > { %v251_v5 = vmax.f32 %v249_v3, %v250_v4  ;;  %595 = vmatprep.subr.bf16.mxu0 %v594_v10  ;;  %v307_v19 = vld [vmem:[%s1046_s29 + $0xa8] sm:$0xff]  ;;  %v600_v21 = vpack.c.bf16 %v289_v17, %v288_v16  ;;  %v290_v23 = vld [vmem:[%s1046_s29 + $0x20] sm:$0xff]  ;;  %v308_v28 = vld [vmem:[%s1046_s29 + $0xb0] sm:$0xff]  ;;  %v266_v0 = vshrl.u32 %v265_v62, 7  ;;  %vm241_vm2 = vcmask 257024   ;;  %s552_s21 = sshll.u32 %s1036_s6, 2 }
  0x5b   : > { %597 = vmatpush3.bf16.msra.mxu0 %v596_v14  ;;  %v602_v22 = vpack.c.bf16 %v307_v19, %v306_v18  ;;  %v291_v24 = vld [vmem:[%s1046_s29 + $0x28] sm:$0xff]  ;;  %v309_v29 = vld [vmem:[%s1046_s29 + $0xb8] sm:$0xff]  ;;  %v292_v32 = vld [vmem:[%s1046_s29 + $0x30] sm:$0xff]  ;;  %v264_v63 = vunpack.c.0.s8 %v263_v61  ;;  %242 = vst.msk [vmem:[#allocation2] sm:$0xf] %vm241_vm2, %v862_v20  ;;  %s554_s16 = sshll.u32 %s846_s12, 6 }
  0x5c   : > { %252 = vmax.xlane.f32.xlu0 %v251_v5  ;;  %599 = vmatprep.subr.bf16.mxu0 %v598_v15  ;;  %v604_v25 = vpack.c.bf16 %v291_v24, %v290_v23  ;;  %v606_v31 = vpack.c.bf16 %v309_v29, %v308_v28  ;;  %v293_v33 = vld [vmem:[%s1046_s29 + $0x38] sm:$0xff]  ;;  %v310_v36 = vld [vmem:[%s1046_s29 + $0xc0] sm:$0xff]  ;;  %v311_v37 = vld [vmem:[%s1046_s29 + $0xc8] sm:$0xff]  ;;  %s231_s19 = scalar_lea.vmem [#allocation10], %s552_s21  ;;  %s1111_s7 = scalar_lea.hbm %s1163_s2, %s554_s16 }
  0x5d   : > { %v608_v34 = vpack.c.bf16 %v293_v33, %v292_v32  ;;  %v610_v38 = vpack.c.bf16 %v311_v37, %v310_v36  ;;  %v294_v39 = vld [vmem:[%s1046_s29 + $0x40] sm:$0xff]  ;;  %v295_v40 = vld [vmem:[%s1046_s29 + $0x48] sm:$0xff]  ;;  %v312_v42 = vld [vmem:[%s1046_s29 + $0xd0] sm:$0xff]  ;;  %v267_v2 = vsub.s32 %v264_v63, %v266_v0  ;;  %s427_s30 = sshll.u32 %s231_s19, 4  ;;  %s413_s8 = scalar_lea.sflag [#allocation7], %s1036_s6  ;;  %s1113_s30 = int_to_ptr.vmem [resolvable:$true] %s427_s30 }
  0x5e   : > { %v1074_v26 = vld [vmem:[#allocation3] sm:$0xf]  ;;  %v612_v41 = vpack.c.bf16 %v295_v40, %v294_v39  ;;  %v313_v43 = vld [vmem:[%s1046_s29 + $0xd8] sm:$0xff]  ;;  %v296_v45 = vld [vmem:[%s1046_s29 + $0x50] sm:$0xff]  ;;  %s768_s15 = scalar_lea.vmem %s1113_s30, 64  ;;  %p1175_p5 = scmp.ne.s32.totalorder %s1168_s22, 0 }
  0x5f   : > { %601 = vmatpush3.bf16.msra.mxu0 %v600_v21  ;;  %v614_v44 = vpack.c.bf16 %v313_v43, %v312_v42  ;;  %v297_v46 = vld [vmem:[%s1046_s29 + $0x58] sm:$0xff]  ;;  %v314_v47 = vld [vmem:[%s1046_s29 + $0xe0] sm:$0xff]  ;;  %v315_v49 = vld [vmem:[%s1046_s29 + $0xe8] sm:$0xff]  ;;  %p769_p0 = scmp.ne.s32.totalorder %s1113_s30, %s768_s15  ;;  %s864_s12 = smov [#allocation10]  }
  0x60   : > { %603 = vmatprep.subr.bf16.mxu0 %v602_v22  ;;  %v616_v48 = vpack.c.bf16 %v297_v46, %v296_v45  ;;  %v298_v50 = vld [vmem:[%s1046_s29 + $0x60] sm:$0xff]  ;;  %v299_v51 = vld [vmem:[%s1046_s29 + $0x68] sm:$0xff]  ;;  %v618_v52 = vpack.c.bf16 %v315_v49, %v314_v47  ;;  %v316_v53 = vld [vmem:[%s1046_s29 + $0xf0] sm:$0xff]  ;;  %s772_s18 = sshll.u32 %s864_s12, 4  ;;  %s773_s18 = int_to_ptr.vmem [resolvable:$false] %s772_s18 }
  0x61   : > { %v317_v54 = vld [vmem:[%s1046_s29 + $0xf8] sm:$0xff]  ;;  %v620_v55 = vpack.c.bf16 %v299_v51, %v298_v50  ;;  %v300_v57 = vld [vmem:[%s1046_s29 + $0x70] sm:$0xff]  ;;  %p770_p7 = pnand %p769_p0, %p1175_p5  ;;  %s774_s4 = scalar_lea.vmem %s773_s18, 128 }
  0x62   : > { %v622_v56 = vpack.c.bf16 %v317_v54, %v316_v53  ;;  %v301_v58 = vld [vmem:[%s1046_s29 + $0x78] sm:$0xff]  ;;  %v388_v19 = vld [vmem:[#allocation2] sm:$0xf]  ;;  %p775_p10 = scmp.lt.s32.totalorder %s1113_s30, %s773_s18  ;;  %p776_p12 = scmp.lt.s32.totalorder %s774_s4, %s768_s15 }
  0x63   : > { %605 = vmatpush3.bf16.msra.mxu0 %v604_v25  ;;  %v624_v59 = vpack.c.bf16 %v301_v58, %v300_v57  ;;  %p771_p13 = pneg %p770_p7 }
  0x64   : > { %607 = vmatprep.subr.bf16.mxu0 %v606_v31  ;;  %p777_p1 = por %p776_p12, %p775_p10 }
  0x66   : > { %p778_p2 = pnand %p777_p1, %p771_p13 }
  0x67   : > { %609 = vmatpush3.bf16.msra.mxu0 %v608_v34 }
  0x68   : > { %611 = vmatprep.subr.bf16.mxu0 %v610_v38 }
  0x6b   : > { %613 = vmatpush3.bf16.msra.mxu0 %v612_v41 }
  0x6c   : > { %615 = vmatprep.subr.bf16.mxu0 %v614_v44 }
  0x6f   : > { %617 = vmatpush3.bf16.msra.mxu0 %v616_v48 }
  0x70   : > { %619 = vmatprep.subr.bf16.mxu0 %v618_v52 }
  0x73   : > { %621 = vmatpush3.bf16.msra.mxu0 %v620_v55 }
  0x74   : > { %623 = vmatprep.subr.bf16.mxu0 %v622_v56 }
  0x77   : > { %625 = vmatpush3.bf16.msra.mxu0 %v624_v59 }
  0xe9   : > { %v253_v27 = vpop.xlane.xlu0 %252 }
  0xea   : > { %v254_v30 = vmax.f32 %v1074_v26, %v253_v27 }
  0xec   : > { %v255_v35 = vsub.f32 %v1074_v26, %v254_v30  ;;  %398 = vst.msk [vmem:[#allocation3] sm:$0xf] %vm238_vm0, %v254_v30  ;;  %260 = vperm.xlu0 %699, %v254_v30  }
  0xee   : > { %v256_v12 = vmul.f32 1.442695, %v255_v35 }
 0x16b   : > { %v261_v3 = vpop.permute.xlu0 %260 }
 0x16c   : > { %v268_v4 = vrot.slane %v261_v3, %v267_v2 }
 0x16e   : > { %v270_v5 = vsub.f32 %v1053_v1, %v268_v4  ;;  %v273_v1 = vld [vmem:[#allocation4] sm:$0xf] }
 0x170   : > { %v271_v6 = vmul.f32 1.442695, %v270_v5 }
 0x172   : > { %702 = vpow2.f32 %v271_v6 }
 0x173   : > { %704 = vpow2.f32 %v256_v12 }
 0x17c   : > { %v703_v7 = vpop.eup %702 }
 0x17d   : > { %v276_v8 = vcombine.high %v703_v7, %v703_v7  ;;  %v278_v9 = vsel %vm248_vm1, %v703_v7, 0.0  ;;  %v705_v13 = vpop.eup %704 }
 0x17e   : > { %v274_v14 = vmul.f32 %v705_v13, %v273_v1 }
 0x17f   : > { %382 = vmatprep.mubr.f32.mxu0 %v276_v8  ;;  %v279_v10 = vsel %vm248_vm1, %v276_v8, 0.0 }
 0x180   : > { %383 = vmatmul.mubr.f32.vlgmr.msra.gmra.mrb[0].mxu0 %v703_v7  ;;  %v280_v11 = vadd.f32 %v279_v10, %v278_v9 }
 0x182   : > { %281 = vadd.xlane.f32.xlu1 %v280_v11 }
 0x193   : > { %391 = vperm.xlu1 %700, %v705_v13  }
 0x20f   : > { %v282_v15 = vpop.xlane.xlu1 %281 }
 0x210   : > { %v283_v16 = vadd.f32 %v282_v15, %v274_v14 }
 0x212   : > { %285 = vst.msk [vmem:[#allocation4] sm:$0xf] %vm238_vm0, %v283_v16 }
 0x213   : > { %v392_v21 = vpop.permute.xlu1 %391 }
 0x214   : > { %v394_v20 = vmul.f32 %v392_v21, %v388_v19 }
 0x219   : > { %v402_v17 = vld [vmem:[#allocation4] sm:$0xf] }
 0x21a   : > { %706 = vrcp.f32 %v402_v17 }
 0x224   : > { %v707_v18 = vpop.eup %706 }
 0x225   : > { %407 = vperm.xlu1 %700, %v707_v18  }
 0x253   : > { %v591_v22 = vpop.f32.mrb[0].mxu0 }
 0x254   : > { %v592_v23 = vpop.f32.mrb[1].mxu0 }
 0x255   : > { %v593_v24 = vadd.f32 %v592_v23, %v591_v22 }
 0x257   : > { %v395_v25 = vadd.f32 %v593_v24, %v394_v20 }
 0x259   : > { %397 = vst.msk [vmem:[#allocation2] sm:$0xf] %vm241_vm2, %v395_v25 }
 0x260   : > { %v404_v26 = vld [vmem:[#allocation2] sm:$0xf] }
 0x2a4   : > { %v408_v27 = vpop.permute.xlu1 %407 }
 0x2a5   : > { %v410_v28 = vmul.f32 %v408_v27, %v404_v26 }
 0x2a7   : > { %411 = vst.msk [vmem:[%s231_s19] sm:$0xf] %vm241_vm2, %v410_v28 }
 0x2a8   : > { %781 = shalt.err (!%p778_p2)
}
 0x2a9   : > { %s782_s6 = scalar_lea.hbm %s1111_s7, 64  ;;  %s786_s27 = scalar_lea.hbm %s1163_s2, 128 }
 0x2aa   : > { %p783_p9 = scmp.ne.s32.totalorder %s1111_s7, %s782_s6  ;;  %p787_p6 = scmp.lt.u32.totalorder %s1111_s7, %s1163_s2 }
 0x2ab   : > { %p788_p4 = scmp.lt.u32.totalorder %s786_s27, %s782_s6  ;;  %p790_p0 = scmp.lt.u32.totalorder %s782_s6, %s1111_s7 }
 0x2ac   : > { %p784_p11 = pnand %p783_p9, %p1175_p5 }
 0x2ad   : > { %p789_p8 = por %p788_p4, %p787_p6 }
 0x2ae   : > { %p785_p3 = pneg %p784_p11 }
 0x2af   : > { %p791_p7 = por %p790_p0, %p789_p8 }
 0x2b1   : > { %p792_p13 = pnand %p791_p7, %p785_p3 }
 0x2b3   : > { %795 = shalt.err (!%p792_p13)
}
 0x2b4   : > { %630 = dma.vmem_to_hbm [thread:$0]  (%p1175_p5), %s1113_s30, 64, %s1111_s7, %s413_s8  }
 0x2b5 PF: > { %s439_s29 = sand.u32 1, %s834_s9   ;;  %p1176_p10 = scmp.ne.s32.totalorder %s1169_s24, 0 }
 0x2b6   : > { %p1177_p12 = scmp.ge.s32.totalorder %s854_s14, 2  ;;  %s440_s21 = scalar_lea.sflag [#allocation7], %s439_s29 }
 0x2b8   : > { %p640_p1 = pnand %p1177_p12, %p1176_p10 }
 0x2ba   : > { %829 = dma.done.wait (!%p640_p1), %s440_s21, 64  }
 0x2bb   : > { %831 = vsyncadd (!%p640_p1), %s440_s21, 4294967232  ;;  %s21_s14 = sadd.s32 1, %s854_s14   ;;  %s1178_s9 = smov %s838_s10 }
 0x2bc   : > { %p18_p2 = scmp.ge.s32.totalorder %s21_s14, 4   ;;  %s1179_s10 = smov %s842_s11 }
 0x2bd   : > { %s1180_s11 = smov %s936_s23  ;;  %s1181_s12 = smov %s850_s13 }
 0x2be   : > { %s1182_s13 = smov %s1184_s17  ;;  %20 = sbr.rel (!%p18_p2) target bundleno = 8 (0x8), region = 94 }
 0x2c5   :  { %445 = vsyncpa [#allocation6], 1 }
 0x2c6   :  { %447 = vsyncpa [#allocation6 + $0x1], 1 }
 0x2c7   :  { %448 = vsyncpa [#allocation9], 1 }
 0x2c8   :  { %450 = vsyncpa [#allocation9 + $0x1], 1 }
 0x2c9   :  { %451 = vsyncpa [#allocation7], 1 }
 0x2ca   :  { %453 = vsyncpa [#allocation7 + $0x1], 1 }

</bundles_post_ra>
